<compile_context>
chip_gen: v5e
topology: v5e:2x2
jax: 0.10.0
libtpu: 0.0.40
codegen_flags: <defaults>
</compile_context>

<pallas_src>
import functools

import jax
import jax.numpy as jnp
from jax.experimental import pallas as pl
from jax.experimental.pallas import tpu as pltpu

HIDDEN = 128
MAX_ROW_TILE = 1024  # rows per grid step; ~1.3 MiB of live blocks -> safe on v7x's 64 MiB VMEM


def _leaky_relu(x, slope):
    return jnp.where(x > 0, x, slope * x)


def gmm_discriminator_kernel(x_ref, w1_ref, b1_ref, w2_ref, b2_ref,
                             w3_ref, b3_ref, w4_ref, b4_ref, o_ref,
                             *, leaky_slope):
    # Layer 1: Linear(1 -> 128). K == 1, so this is a pure VPU broadcast
    # multiply-add — no MXU work and no 128x-padded input DMA.
    h = x_ref[...] * w1_ref[...] + b1_ref[...]          # (TB,1)*(1,128)+(1,128) -> (TB,128)
    h = _leaky_relu(h, leaky_slope)

    # Layers 2/3: 128x128 MXU matmuls, bf16 inputs, f32 accumulation.
    h = jnp.dot(h.astype(jnp.bfloat16), w2_ref[...],
                preferred_element_type=jnp.float32) + b2_ref[...]
    h = _leaky_relu(h, leaky_slope)
    h = jnp.dot(h.astype(jnp.bfloat16), w3_ref[...],
                preferred_element_type=jnp.float32) + b3_ref[...]
    h = _leaky_relu(h, leaky_slope)

    # Layer 4: Linear(128 -> n_out), narrow output stored directly.
    out = jnp.dot(h.astype(jnp.bfloat16), w4_ref[...],
                  preferred_element_type=jnp.float32) + b4_ref[...]
    o_ref[...] = out.astype(o_ref.dtype)


def init_params(key, num_generators):
    """Deterministic init mimicking PyTorch Linear default (U(-1/sqrt(fan_in), +))."""
    dims = [(1, HIDDEN), (HIDDEN, HIDDEN), (HIDDEN, HIDDEN), (HIDDEN, num_generators + 1)]
    params = []
    keys = jax.random.split(key, 2 * len(dims))
    for i, (fan_in, fan_out) in enumerate(dims):
        bound = 1.0 / jnp.sqrt(float(fan_in))
        w = jax.random.uniform(keys[2 * i], (fan_in, fan_out),
                               minval=-bound, maxval=bound, dtype=jnp.float32)
        b = jax.random.uniform(keys[2 * i + 1], (1, fan_out),
                               minval=-bound, maxval=bound, dtype=jnp.float32)
        params.append((w, b))
    return params


def gmm_discriminator(x, params, leaky_slope):
    """x: (B, 1) -> (B, num_generators+1) float32."""
    (w1, b1), (w2, b2), (w3, b3), (w4, b4) = params
    B = x.shape[0]
    n_out = w4.shape[1]

    x = x.astype(jnp.float32).reshape(B, 1)

    # Row tile: large for big B (pipelining / per-step overhead amortization),
    # shrunk (8-aligned) for small B so we never over-pad tiny batches.
    tb = min(MAX_ROW_TILE, max(8, ((B + 7) // 8) * 8))
    b_pad = ((B + tb - 1) // tb) * tb
    if b_pad != B:
        x = jnp.pad(x, ((0, b_pad - B), (0, 0)))   # zero rows; sliced off after the call

    # Pre-cast MXU-layer weights to bf16 once (accumulation stays f32 in-kernel).
    w2b = w2.astype(jnp.bfloat16)
    w3b = w3.astype(jnp.bfloat16)
    w4b = w4.astype(jnp.bfloat16)

    kernel = functools.partial(gmm_discriminator_kernel, leaky_slope=leaky_slope)
    grid = (b_pad // tb,)

    def row_spec(shape):
        return pl.BlockSpec(shape, lambda i: (i, 0))

    def resident_spec(shape):
        return pl.BlockSpec(shape, lambda i: (0, 0))   # same block every step -> stays in VMEM

    out = pl.pallas_call(
        kernel,
        out_shape=jax.ShapeDtypeStruct((b_pad, n_out), jnp.float32),
        grid=grid,
        in_specs=[
            row_spec((tb, 1)),                    # x
            resident_spec((1, HIDDEN)),           # w1 (row vector, used on VPU)
            resident_spec((1, HIDDEN)),           # b1
            resident_spec((HIDDEN, HIDDEN)),      # w2 (bf16)
            resident_spec((1, HIDDEN)),           # b2
            resident_spec((HIDDEN, HIDDEN)),      # w3 (bf16)
            resident_spec((1, HIDDEN)),           # b3
            resident_spec((HIDDEN, n_out)),       # w4 (bf16)
            resident_spec((1, n_out)),            # b4
        ],
        out_specs=row_spec((tb, n_out)),
        compiler_params=pltpu.CompilerParams(
            dimension_semantics=("parallel",)),   # megacore sharding on v7x; no-op on v5e/v6e
    )(x, w1, b1, w2b, b2, w3b, b3, w4b, b4)

    return out[:B] if b_pad != B else out


def _reference(x, params, leaky_slope, bf16_matmuls):
    """Pure-JAX reference. bf16_matmuls=True mirrors the kernel's MXU precision."""
    (w1, b1), (w2, b2), (w3, b3), (w4, b4) = params
    h = x.astype(jnp.float32).reshape(x.shape[0], 1)
    h = h * w1 + b1
    h = jnp.where(h > 0, h, leaky_slope * h)
    for (w, b), act in [((w2, b2), True), ((w3, b3), True), ((w4, b4), False)]:
        if bf16_matmuls:
            h = jnp.dot(h.astype(jnp.bfloat16), w.astype(jnp.bfloat16),
                        preferred_element_type=jnp.float32) + b
        else:
            h = h @ w + b
        if act:
            h = jnp.where(h > 0, h, leaky_slope * h)
    return h


if __name__ == "__main__":
    num_generators = 4
    leaky_slope = 0.2
    batch = 8

    key = jax.random.PRNGKey(0)
    k_params, k_x = jax.random.split(key)
    params = init_params(k_params, num_generators)
    x = jax.random.normal(k_x, (batch, 1), dtype=jnp.float32)

    out = gmm_discriminator(x, params, leaky_slope)
    out = jax.block_until_ready(out)
    assert out.shape == (batch, num_generators + 1), out.shape

    # Tight check vs a precision-matched (bf16-matmul) reference.
    ref_bf16 = _reference(x, params, leaky_slope, bf16_matmuls=True)
    assert jnp.allclose(out, ref_bf16, atol=1e-3, rtol=1e-3), "mismatch vs bf16-matched reference"

    # Loose check vs the full-f32 PyTorch-equivalent forward.
    ref_f32 = _reference(x, params, leaky_slope, bf16_matmuls=False)
    assert jnp.allclose(out, ref_f32, atol=5e-2, rtol=5e-2), "mismatch vs f32 reference"

    print("KERNEL_OK")
</pallas_src>

<mosaic_0001>
module attributes {stable_mosaic.version = 11 : i64} {
  func.func @gmm_discriminator_kernel(%arg0: i32, %arg1: memref<8x1xf32, #tpu.memory_space<vmem>>, %arg2: memref<1x128xf32, #tpu.memory_space<vmem>>, %arg3: memref<1x128xf32, #tpu.memory_space<vmem>>, %arg4: memref<128x128xbf16, #tpu.memory_space<vmem>>, %arg5: memref<1x128xf32, #tpu.memory_space<vmem>>, %arg6: memref<128x128xbf16, #tpu.memory_space<vmem>>, %arg7: memref<1x128xf32, #tpu.memory_space<vmem>>, %arg8: memref<128x5xbf16, #tpu.memory_space<vmem>>, %arg9: memref<1x5xf32, #tpu.memory_space<vmem>>, %arg10: memref<8x5xf32, #tpu.memory_space<vmem>>) attributes {dimension_semantics = [#tpu.dimension_semantics<parallel>], iteration_bounds = array<i64: 1>, scalar_prefetch = 0 : i64, scratch_operands = 0 : i64, tpu.core_type = #tpu.core_type<tc>, window_params = [{transform_indices = @transform_0, window_bounds = array<i64: 8, 1>}, {pipeline_mode = #tpu.pipeline_mode<synchronous>, transform_indices = @transform_1, window_bounds = array<i64: 1, 128>}, {pipeline_mode = #tpu.pipeline_mode<synchronous>, transform_indices = @transform_2, window_bounds = array<i64: 1, 128>}, {pipeline_mode = #tpu.pipeline_mode<synchronous>, transform_indices = @transform_3, window_bounds = array<i64: 128, 128>}, {pipeline_mode = #tpu.pipeline_mode<synchronous>, transform_indices = @transform_4, window_bounds = array<i64: 1, 128>}, {pipeline_mode = #tpu.pipeline_mode<synchronous>, transform_indices = @transform_5, window_bounds = array<i64: 128, 128>}, {pipeline_mode = #tpu.pipeline_mode<synchronous>, transform_indices = @transform_6, window_bounds = array<i64: 1, 128>}, {pipeline_mode = #tpu.pipeline_mode<synchronous>, transform_indices = @transform_7, window_bounds = array<i64: 128, 5>}, {pipeline_mode = #tpu.pipeline_mode<synchronous>, transform_indices = @transform_8, window_bounds = array<i64: 1, 5>}, {transform_indices = @transform_9, window_bounds = array<i64: 8, 5>}]} {
    %c0 = arith.constant 0 : index
    %c0_0 = arith.constant 0 : index
    %0 = vector.load %arg1[%c0, %c0_0] : memref<8x1xf32, #tpu.memory_space<vmem>>, vector<8x1xf32>
    %c0_1 = arith.constant 0 : index
    %c0_2 = arith.constant 0 : index
    %1 = vector.load %arg2[%c0_1, %c0_2] : memref<1x128xf32, #tpu.memory_space<vmem>>, vector<1x128xf32>
    %2 = vector.broadcast %0 : vector<8x1xf32> to vector<8x128xf32>
    %3 = vector.broadcast %1 : vector<1x128xf32> to vector<8x128xf32>
    %4 = arith.mulf %2, %3 : vector<8x128xf32>
    %c0_3 = arith.constant 0 : index
    %c0_4 = arith.constant 0 : index
    %5 = vector.load %arg3[%c0_3, %c0_4] : memref<1x128xf32, #tpu.memory_space<vmem>>, vector<1x128xf32>
    %6 = vector.broadcast %5 : vector<1x128xf32> to vector<8x128xf32>
    %7 = arith.addf %4, %6 : vector<8x128xf32>
    %cst = arith.constant 0.000000e+00 : f32
    %8 = vector.broadcast %cst : f32 to vector<8x128xf32>
    %9 = arith.cmpf ogt, %7, %8 : vector<8x128xf32>
    %cst_5 = arith.constant 2.000000e-01 : f32
    %10 = vector.broadcast %cst_5 : f32 to vector<8x128xf32>
    %11 = arith.mulf %10, %7 : vector<8x128xf32>
    %12 = arith.select %9, %7, %11 : vector<8x128xi1>, vector<8x128xf32>
    %13 = arith.truncf %12 : vector<8x128xf32> to vector<8x128xbf16>
    %c0_6 = arith.constant 0 : index
    %c0_7 = arith.constant 0 : index
    %14 = vector.load %arg4[%c0_6, %c0_7] : memref<128x128xbf16, #tpu.memory_space<vmem>>, vector<128x128xbf16>
    %cst_8 = arith.constant dense<0.000000e+00> : vector<8x128xf32>
    %15 = tpu.matmul %13, %14, %cst_8 {dimension_numbers = #tpu.dot_dimension_numbers<[1], [0], [0], [1], [0, 0, 1, 1], [], []>} : vector<8x128xbf16>, vector<128x128xbf16>, vector<8x128xf32> -> vector<8x128xf32>
    %c0_9 = arith.constant 0 : index
    %c0_10 = arith.constant 0 : index
    %16 = vector.load %arg5[%c0_9, %c0_10] : memref<1x128xf32, #tpu.memory_space<vmem>>, vector<1x128xf32>
    %17 = vector.broadcast %16 : vector<1x128xf32> to vector<8x128xf32>
    %18 = arith.addf %15, %17 : vector<8x128xf32>
    %cst_11 = arith.constant 0.000000e+00 : f32
    %19 = vector.broadcast %cst_11 : f32 to vector<8x128xf32>
    %20 = arith.cmpf ogt, %18, %19 : vector<8x128xf32>
    %cst_12 = arith.constant 2.000000e-01 : f32
    %21 = vector.broadcast %cst_12 : f32 to vector<8x128xf32>
    %22 = arith.mulf %21, %18 : vector<8x128xf32>
    %23 = arith.select %20, %18, %22 : vector<8x128xi1>, vector<8x128xf32>
    %24 = arith.truncf %23 : vector<8x128xf32> to vector<8x128xbf16>
    %c0_13 = arith.constant 0 : index
    %c0_14 = arith.constant 0 : index
    %25 = vector.load %arg6[%c0_13, %c0_14] : memref<128x128xbf16, #tpu.memory_space<vmem>>, vector<128x128xbf16>
    %cst_15 = arith.constant dense<0.000000e+00> : vector<8x128xf32>
    %26 = tpu.matmul %24, %25, %cst_15 {dimension_numbers = #tpu.dot_dimension_numbers<[1], [0], [0], [1], [0, 0, 1, 1], [], []>} : vector<8x128xbf16>, vector<128x128xbf16>, vector<8x128xf32> -> vector<8x128xf32>
    %c0_16 = arith.constant 0 : index
    %c0_17 = arith.constant 0 : index
    %27 = vector.load %arg7[%c0_16, %c0_17] : memref<1x128xf32, #tpu.memory_space<vmem>>, vector<1x128xf32>
    %28 = vector.broadcast %27 : vector<1x128xf32> to vector<8x128xf32>
    %29 = arith.addf %26, %28 : vector<8x128xf32>
    %cst_18 = arith.constant 0.000000e+00 : f32
    %30 = vector.broadcast %cst_18 : f32 to vector<8x128xf32>
    %31 = arith.cmpf ogt, %29, %30 : vector<8x128xf32>
    %cst_19 = arith.constant 2.000000e-01 : f32
    %32 = vector.broadcast %cst_19 : f32 to vector<8x128xf32>
    %33 = arith.mulf %32, %29 : vector<8x128xf32>
    %34 = arith.select %31, %29, %33 : vector<8x128xi1>, vector<8x128xf32>
    %35 = arith.truncf %34 : vector<8x128xf32> to vector<8x128xbf16>
    %c0_20 = arith.constant 0 : index
    %c0_21 = arith.constant 0 : index
    %36 = vector.load %arg8[%c0_20, %c0_21] : memref<128x5xbf16, #tpu.memory_space<vmem>>, vector<128x5xbf16>
    %cst_22 = arith.constant dense<0.000000e+00> : vector<8x5xf32>
    %37 = tpu.matmul %35, %36, %cst_22 {dimension_numbers = #tpu.dot_dimension_numbers<[1], [0], [0], [1], [0, 0, 1, 1], [], []>} : vector<8x128xbf16>, vector<128x5xbf16>, vector<8x5xf32> -> vector<8x5xf32>
    %c0_23 = arith.constant 0 : index
    %c0_24 = arith.constant 0 : index
    %38 = vector.load %arg9[%c0_23, %c0_24] : memref<1x5xf32, #tpu.memory_space<vmem>>, vector<1x5xf32>
    %39 = vector.broadcast %38 : vector<1x5xf32> to vector<8x5xf32>
    %40 = arith.addf %37, %39 : vector<8x5xf32>
    %c0_25 = arith.constant 0 : index
    %c0_26 = arith.constant 0 : index
    %41 = vector.load %arg10[%c0_25, %c0_26] : memref<8x5xf32, #tpu.memory_space<vmem>>, vector<8x5xf32>
    tpu.vector_store %arg10[%c0_25, %c0_26], %40 {strides = array<i32>} : memref<8x5xf32, #tpu.memory_space<vmem>>, vector<8x5xf32>,
    return
  }
  func.func @transform_0(%arg0: i32) -> (i32, i32) {
    %c0_i32 = arith.constant 0 : i32
    %c0_i32_0 = arith.constant 0 : i32
    return %arg0, %c0_i32 : i32, i32
  }
  func.func @transform_1(%arg0: i32) -> (i32, i32) {
    %c0_i32 = arith.constant 0 : i32
    %c0_i32_0 = arith.constant 0 : i32
    %c0_i32_1 = arith.constant 0 : i32
    return %c0_i32, %c0_i32_0 : i32, i32
  }
  func.func @transform_2(%arg0: i32) -> (i32, i32) {
    %c0_i32 = arith.constant 0 : i32
    %c0_i32_0 = arith.constant 0 : i32
    %c0_i32_1 = arith.constant 0 : i32
    return %c0_i32, %c0_i32_0 : i32, i32
  }
  func.func @transform_3(%arg0: i32) -> (i32, i32) {
    %c0_i32 = arith.constant 0 : i32
    %c0_i32_0 = arith.constant 0 : i32
    %c0_i32_1 = arith.constant 0 : i32
    return %c0_i32, %c0_i32_0 : i32, i32
  }
  func.func @transform_4(%arg0: i32) -> (i32, i32) {
    %c0_i32 = arith.constant 0 : i32
    %c0_i32_0 = arith.constant 0 : i32
    %c0_i32_1 = arith.constant 0 : i32
    return %c0_i32, %c0_i32_0 : i32, i32
  }
  func.func @transform_5(%arg0: i32) -> (i32, i32) {
    %c0_i32 = arith.constant 0 : i32
    %c0_i32_0 = arith.constant 0 : i32
    %c0_i32_1 = arith.constant 0 : i32
    return %c0_i32, %c0_i32_0 : i32, i32
  }
  func.func @transform_6(%arg0: i32) -> (i32, i32) {
    %c0_i32 = arith.constant 0 : i32
    %c0_i32_0 = arith.constant 0 : i32
    %c0_i32_1 = arith.constant 0 : i32
    return %c0_i32, %c0_i32_0 : i32, i32
  }
  func.func @transform_7(%arg0: i32) -> (i32, i32) {
    %c0_i32 = arith.constant 0 : i32
    %c0_i32_0 = arith.constant 0 : i32
    %c0_i32_1 = arith.constant 0 : i32
    return %c0_i32, %c0_i32_0 : i32, i32
  }
  func.func @transform_8(%arg0: i32) -> (i32, i32) {
    %c0_i32 = arith.constant 0 : i32
    %c0_i32_0 = arith.constant 0 : i32
    %c0_i32_1 = arith.constant 0 : i32
    return %c0_i32, %c0_i32_0 : i32, i32
  }
  func.func @transform_9(%arg0: i32) -> (i32, i32) {
    %c0_i32 = arith.constant 0 : i32
    %c0_i32_0 = arith.constant 0 : i32
    return %arg0, %c0_i32 : i32, i32
  }
}

</mosaic_0001>

<bundles_post_ra>
// kernel: tpu_custom_call.1
= control target key start
LH: loop header
LB: loop body
LE: loop exit
PB: predicated region body
PF: predicated region fallthrough
CT: control target
= control target key end

     0   :  { %14 = vsyncpa [#allocation3], 0  ;;  %s649_s0 = inlined_call_operand.vmem [shape: f32[8,1], index: 0, kind: input, shape index: {}]   ;;  %s650_s1 = inlined_call_operand.vmem [shape: f32[1,128], index: 1, kind: input, shape index: {}]   ;;  %s651_s2 = inlined_call_operand.vmem [shape: f32[1,128], index: 2, kind: input, shape index: {}]   ;;  %s652_s3 = inlined_call_operand.vmem [shape: bf16[128,128], index: 3, kind: input, shape index: {}]   ;;  %s653_s4 = inlined_call_operand.vmem [shape: f32[1,128], index: 4, kind: input, shape index: {}]   ;;  %s654_s5 = inlined_call_operand.hbm [shape: bf16[128,128], index: 5, kind: input, shape index: {}]   ;;  %s655_s6 = inlined_call_operand.vmem [shape: f32[1,128], index: 6, kind: input, shape index: {}]   ;;  %s656_s7 = inlined_call_operand.vmem [shape: bf16[128,5], index: 7, kind: input, shape index: {}]   ;;  %s657_s8 = inlined_call_operand.vmem [shape: f32[1,5], index: 8, kind: input, shape index: {}]   ;;  %s658_s9 = inlined_call_operand.hbm [shape: f32[8,5], index: 9, kind: output, shape index: {}]  }
   0x1   :  { %15 = vsyncpa [#allocation4], 0  ;;  %s30_s11 = sshll.u32 %s654_s5, 4  ;;  %s522_s12 = smov [#allocation2]   ;;  %s31_s11 = int_to_ptr.hbm [resolvable:$true] %s30_s11 }
   0x2   :  { %s32_s13 = sshll.u32 %s522_s12, 4  ;;  %s523_s14 = smov 64   ;;  %s33_s13 = int_to_ptr.vmem [resolvable:$true] %s32_s13 }
   0x3   :  { %s524_s15 = smov 4  }
   0x4   :  { %38 = dma.hbm_to_vmem [thread:$0]  %s31_s11, 1024, %s33_s13, [#allocation3], %s523_s14, %s523_s14, %s524_s15  }
   0x5   :  { %518 = dma.done.wait [#allocation3], 1024  }
   0x6   :  { %519 = vsyncadd [#allocation3], 4294966272  ;;  %v525_v0 = vmov 0   ;;  %v49_v1 = vld [vmem:[%s649_s0] sm:$0xff]  ;;  %v442_v2 = vld [vmem:[%s652_s3 + $0x38] sm:$0xff]  ;;  %s526_s10 = smov [#allocation5]  }
   0x7   :  { %464 = vset.pattern.permute.xlu0 %v525_v0  ;;  %137 = vmatpush.bf16.msra.mxu0 %v442_v2  ;;  %v441_v3 = vld [vmem:[%s652_s3 + $0x30] sm:$0xff]  ;;  %v440_v4 = vld [vmem:[%s652_s3 + $0x28] sm:$0xff]  ;;  %v439_v5 = vld [vmem:[%s652_s3 + $0x20] sm:$0xff]  ;;  %s327_s11 = sshll.u32 %s526_s10, 4  ;;  %s329_s13 = sshll.u32 %s658_s9, 4  ;;  %vm320_vm3 = vcmask 39936   ;;  %s328_s11 = int_to_ptr.vmem [resolvable:$true] %s327_s11  ;;  %s330_s13 = int_to_ptr.hbm [resolvable:$true] %s329_s13 }
   0x8   :  { %53 = vperm.xlu0 %464, %v49_v1   ;;  %v438_v6 = vld [vmem:[%s652_s3 + $0x18] sm:$0xff]  ;;  %v437_v7 = vld [vmem:[%s652_s3 + $0x10] sm:$0xff]  ;;  %v436_v8 = vld [vmem:[%s652_s3 + $0x8] sm:$0xff] }
   0x9   :  { %v435_v9 = vld [vmem:[%s652_s3] sm:$0xff]  ;;  %v450_v10 = vld [vmem:[#allocation2 + $0x38] sm:$0xff]  ;;  %v449_v11 = vld [vmem:[#allocation2 + $0x30] sm:$0xff] }
   0xa   :  { %222 = vmatpush.bf16.msra.mxu1 %v450_v10  ;;  %v448_v12 = vld [vmem:[#allocation2 + $0x28] sm:$0xff]  ;;  %v447_v13 = vld [vmem:[#allocation2 + $0x20] sm:$0xff]  ;;  %v446_v14 = vld [vmem:[#allocation2 + $0x18] sm:$0xff] }
   0xb   :  { %138 = vmatpush.bf16.msra.mxu0 %v441_v3  ;;  %v445_v15 = vld [vmem:[#allocation2 + $0x10] sm:$0xff]  ;;  %v465_v16 = vld [vmem:[%s650_s1] ss:$0 sm:$0xff]  ;;  %v444_v24 = vld [vmem:[#allocation2 + $0x8] sm:$0xff] }
   0xc   :  { %v466_v17 = vld [vmem:[%s651_s2] ss:$0 sm:$0xff]  ;;  %v458_v26 = vld [vmem:[%s656_s7 + $0x38] sm:$0xff]  ;;  %v457_v27 = vld [vmem:[%s656_s7 + $0x30] sm:$0xff] }
   0xd   :  { %v443_v25 = vld [vmem:[#allocation2] sm:$0xff]  ;;  %307 = vmatpush.bf16.msra.mxu2 %v458_v26  ;;  %v456_v28 = vld [vmem:[%s656_s7 + $0x28] sm:$0xff]  ;;  %v454_v30 = vld [vmem:[%s656_s7 + $0x18] sm:$0xff] }
   0xe   :  { %223 = vmatpush.bf16.msra.mxu1 %v449_v11  ;;  %v455_v29 = vld [vmem:[%s656_s7 + $0x20] sm:$0xff]  ;;  %v453_v31 = vld [vmem:[%s656_s7 + $0x10] sm:$0xff]  ;;  %v452_v39 = vld [vmem:[%s656_s7 + $0x8] sm:$0xff] }
   0xf   :  { %139 = vmatpush.bf16.msra.mxu0 %v440_v4  ;;  %v467_v32 = vld [vmem:[%s653_s4] ss:$0 sm:$0xff] }
  0x10   :  { %v451_v40 = vld [vmem:[%s656_s7] sm:$0xff] }
  0x11   :  { %308 = vmatpush.bf16.msra.mxu2 %v457_v27  ;;  %v468_v41 = vld [vmem:[%s655_s6] ss:$0 sm:$0xff] }
  0x12   :  { %224 = vmatpush.bf16.msra.mxu1 %v448_v12  ;;  %v469_v48 = vld [vmem:[%s657_s8] ss:$0 sm:$0xff] }
  0x13   :  { %140 = vmatpush.bf16.msra.mxu0 %v439_v5 }
  0x15   :  { %309 = vmatpush.bf16.msra.mxu2 %v456_v28 }
  0x16   :  { %225 = vmatpush.bf16.msra.mxu1 %v447_v13 }
  0x17   :  { %141 = vmatpush.bf16.msra.mxu0 %v438_v6 }
  0x19   :  { %310 = vmatpush.bf16.msra.mxu2 %v455_v29 }
  0x1a   :  { %226 = vmatpush.bf16.msra.mxu1 %v446_v14 }
  0x1b   :  { %142 = vmatpush.bf16.msra.mxu0 %v437_v7 }
  0x1d   :  { %311 = vmatpush.bf16.msra.mxu2 %v454_v30 }
  0x1e   :  { %227 = vmatpush.bf16.msra.mxu1 %v445_v15 }
  0x1f   :  { %143 = vmatpush.bf16.msra.mxu0 %v436_v8 }
  0x21   :  { %312 = vmatpush.bf16.msra.mxu2 %v453_v31 }
  0x22   :  { %228 = vmatpush.bf16.msra.mxu1 %v444_v24 }
  0x23   :  { %144 = vmatpush.bf16.msra.mxu0 %v435_v9 }
  0x25   :  { %313 = vmatpush.bf16.msra.mxu2 %v452_v39 }
  0x26   :  { %229 = vmatpush.bf16.msra.mxu1 %v443_v25 }
  0x29   :  { %314 = vmatpush.bf16.msra.mxu2 %v451_v40 }
  0x7a   :  { %v54_v18 = vpop.permute.xlu0 %53 }
  0x7b   :  { %v59_v19 = vmul.f32 %v465_v16, %v54_v18 }
  0x7d   :  { %v64_v20 = vadd.f32 %v466_v17, %v59_v19 }
  0x7f   :  { %vm65_vm0 = vcmp.gt.f32.partialorder %v64_v20, 0.0  ;;  %v66_v21 = vmul.f32 0.2, %v64_v20 }
  0x81   :  { %v67_v22 = vsel %vm65_vm0, %v64_v20, %v66_v21 }
  0x82   :  { %v68_v23 = vpack.c.bf16 %v67_v22, %v67_v22 }
  0x84   :  { %145 = vmatmul.bf16.vlgmr.msra.gmra.mxu0 %v68_v23 }
 0x101   :  { %v146_v33 = vpop.f32.mrf.mxu0 }
 0x102   :  { %v147_v34 = vadd.f32 %v467_v32, %v146_v33 }
 0x104   :  { %v151_v35 = vmul.f32 0.2, %v147_v34  ;;  %vm150_vm1 = vcmp.gt.f32.partialorder %v147_v34, 0.0 }
 0x106   :  { %v152_v36 = vsel %vm150_vm1, %v147_v34, %v151_v35 }
 0x107   :  { %v153_v37 = vpack.c.bf16 %v152_v36, %v152_v36 }
 0x109   :  { %v148_v38 = vpop.f32.mrf.mxu0  ;;  %230 = vmatmul.bf16.vlgmr.msra.gmra.mxu1 %v153_v37 }
 0x186   :  { %v231_v42 = vpop.f32.mrf.mxu1 }
 0x187   :  { %v232_v43 = vadd.f32 %v468_v41, %v231_v42 }
 0x189   :  { %v236_v44 = vmul.f32 0.2, %v232_v43  ;;  %vm235_vm2 = vcmp.gt.f32.partialorder %v232_v43, 0.0 }
 0x18b   :  { %v237_v45 = vsel %vm235_vm2, %v232_v43, %v236_v44 }
 0x18c   :  { %v238_v46 = vpack.c.bf16 %v237_v45, %v237_v45 }
 0x18e   :  { %v233_v47 = vpop.f32.mrf.mxu1  ;;  %315 = vmatmul.bf16.vlgmr.msra.gmra.mxu2 %v238_v46 }
 0x211   :  { %v316_v49 = vpop.f32.mrf.mxu2 }
 0x212   :  { %v317_v50 = vadd.f32 %v469_v48, %v316_v49 }
 0x214   :  { %321 = vst.msk [vmem:[#allocation5] sm:$0xff] %vm320_vm3, %v317_v50 }
 0x215   :  { %332 = dma.vmem_to_hbm [thread:$0]  %s328_s11, 128, %s330_s13, [#allocation4]  }
 0x219   :  { %v318_v51 = vpop.f32.mrf.mxu2 }
 0x21a   :  { %520 = dma.done.wait [#allocation4], 128  }
 0x21b   :  { %521 = vsyncadd [#allocation4], 4294967168 }
 0x21c   :  { %337 = vsyncpa [#allocation3], 1 }
 0x21d   :  { %338 = vsyncpa [#allocation4], 1 }

</bundles_post_ra>
